<compile_context>
chip_gen: v5e
topology: v5e:2x2
jax: 0.10.0
libtpu: 0.0.40
codegen_flags: <defaults>
</compile_context>

<pallas_src>
import jax
import jax.numpy as jnp
import numpy as np
from jax.experimental import pallas as pl
from jax.experimental.pallas import tpu as pltpu

# Small, MXU-friendly synthetic shapes consistent with the module.
EMBED_DIM = 64
FFN_DIM = 128
NUM_HEADS = 4
HEAD_DIM = EMBED_DIM // NUM_HEADS
SEQ = 8
BATCH = 2
EPS = 1e-5  # torch.nn.LayerNorm default


def _layer_norm(x, gamma, beta):
    mean = jnp.mean(x, axis=-1, keepdims=True)
    var = jnp.mean((x - mean) ** 2, axis=-1, keepdims=True)
    return (x - mean) * jax.lax.rsqrt(var + EPS) * gamma + beta


def encoder_layer_kernel(x_ref,
                         wqkv_ref, bqkv_ref,
                         wo_ref, bo_ref,
                         g1_ref, be1_ref,
                         w1_ref, b1_ref, w2_ref, b2_ref,
                         g2_ref, be2_ref,
                         out_ref):
    x = x_ref[...]                                       # (R, D), R = T*B, t-major rows
    R = x.shape[0]
    residual = x

    # ---- fused QKV projection (head_dim**-0.5 already folded into Q columns) ----
    qkv = jnp.dot(x, wqkv_ref[...],
                  preferred_element_type=jnp.float32) + bqkv_ref[...]   # (R, 3D)

    # Rows are t-major (row = t*B + b): attention may only mix rows of the same
    # batch element.  Build the cross-batch mask once (hoisted out of the loop).
    row_b = jax.lax.broadcasted_iota(jnp.int32, (R, R), 0) % BATCH
    col_b = jax.lax.broadcasted_iota(jnp.int32, (R, R), 1) % BATCH
    same_batch = row_b == col_b
    neg = jnp.float32(-1e30)

    wo = wo_ref[...]                                     # (D, D)

    # ---- multi-head attention, folded directly into the output projection ----
    attn = None
    for h in range(NUM_HEADS):                           # static unroll, H = 4
        q_h = qkv[:, h * HEAD_DIM:(h + 1) * HEAD_DIM]
        k_h = qkv[:, EMBED_DIM + h * HEAD_DIM:EMBED_DIM + (h + 1) * HEAD_DIM]
        v_h = qkv[:, 2 * EMBED_DIM + h * HEAD_DIM:2 * EMBED_DIM + (h + 1) * HEAD_DIM]

        s = jnp.dot(q_h, k_h.T, preferred_element_type=jnp.float32)     # (R, R)
        s = jnp.where(same_batch, s, neg)                # mask cross-batch pairs
        s = s - jnp.max(s, axis=-1, keepdims=True)
        p = jnp.exp(s)
        p = p * pl.reciprocal(jnp.sum(p, axis=-1, keepdims=True), approx=True)

        o_h = jnp.dot(p, v_h, preferred_element_type=jnp.float32)       # (R, HEAD_DIM)
        # concat(heads) @ Wo  ==  sum_h  o_h @ Wo[h*hd:(h+1)*hd, :]
        contrib = jnp.dot(o_h, wo[h * HEAD_DIM:(h + 1) * HEAD_DIM, :],
                          preferred_element_type=jnp.float32)            # (R, D)
        attn = contrib if attn is None else attn + contrib
    attn = attn + bo_ref[...]

    # dropout(p=0.1) is identity in eval mode
    x = residual + attn
    x = _layer_norm(x, g1_ref[...], be1_ref[...])        # self_attn_layer_norm

    # ---- feed-forward ----
    residual = x
    h1 = jnp.maximum(
        jnp.dot(x, w1_ref[...], preferred_element_type=jnp.float32) + b1_ref[...], 0.0)
    y = jnp.dot(h1, w2_ref[...], preferred_element_type=jnp.float32) + b2_ref[...]
    x = residual + y
    x = _layer_norm(x, g2_ref[...], be2_ref[...])        # final_layer_norm

    out_ref[...] = x


def transformer_sentence_encoder_layer(x_tbd, fused_params):
    """x_tbd: (T, B, D) float32.  Returns (y_tbd, attn=None) — the module's
    forward uses need_weights=False so attn is None."""
    T, B, D = x_tbd.shape
    assert B == BATCH and D == EMBED_DIM and T == SEQ

    # (T, B, D) -> (T*B, D) is a free row-major reshape — no wrapper transpose.
    x2d = x_tbd.reshape(T * B, D)

    in_specs = [pl.BlockSpec((T * B, D), lambda i: (0, 0))]
    for p in fused_params:
        in_specs.append(pl.BlockSpec(p.shape, lambda i, nd=p.ndim: (0,) * nd))

    out = pl.pallas_call(
        encoder_layer_kernel,
        out_shape=jax.ShapeDtypeStruct((T * B, D), jnp.float32),
        grid=(1,),                       # single step: fixed overhead paid once
        in_specs=in_specs,
        out_specs=pl.BlockSpec((T * B, D), lambda i: (0, 0)),
        # Single fused step — no megacore sharding needed at this toy size.
        # At realistic batch sizes, reintroduce a leading "parallel" batch axis
        # so v7x's two TensorCores both get work.
        compiler_params=pltpu.CompilerParams(dimension_semantics=("arbitrary",)),
    )(x2d, *fused_params)

    return out.reshape(T, B, D), None


def init_params(key):
    """Deterministic synthetic parameters in 'torch-like' form.  Linear weights
    are stored (in, out) so y = x @ W + b (== torch's x @ W_t.T + b)."""
    ks = jax.random.split(key, 8)
    s = 0.05
    wq = s * jax.random.normal(ks[0], (EMBED_DIM, EMBED_DIM), jnp.float32)
    wk = s * jax.random.normal(ks[1], (EMBED_DIM, EMBED_DIM), jnp.float32)
    wv = s * jax.random.normal(ks[2], (EMBED_DIM, EMBED_DIM), jnp.float32)
    wo = s * jax.random.normal(ks[3], (EMBED_DIM, EMBED_DIM), jnp.float32)
    w1 = s * jax.random.normal(ks[4], (EMBED_DIM, FFN_DIM), jnp.float32)
    w2 = s * jax.random.normal(ks[5], (FFN_DIM, EMBED_DIM), jnp.float32)
    bq = s * jax.random.normal(ks[6], (1, EMBED_DIM), jnp.float32)
    bk = jnp.zeros((1, EMBED_DIM), jnp.float32)
    bv = s * jax.random.normal(ks[7], (1, EMBED_DIM), jnp.float32)
    bo = jnp.zeros((1, EMBED_DIM), jnp.float32)
    b1 = jnp.zeros((1, FFN_DIM), jnp.float32)
    b2 = jnp.zeros((1, EMBED_DIM), jnp.float32)
    g1 = jnp.ones((1, EMBED_DIM), jnp.float32)
    be1 = jnp.zeros((1, EMBED_DIM), jnp.float32)
    g2 = jnp.ones((1, EMBED_DIM), jnp.float32)
    be2 = jnp.zeros((1, EMBED_DIM), jnp.float32)
    return [wq, bq, wk, bk, wv, bv, wo, bo, g1, be1, w1, b1, w2, b2, g2, be2]


def fuse_params(params):
    """One-time host-side fold: concat Wq|Wk|Wv into a (D, 3D) weight and fold
    the head_dim**-0.5 scaling into the Q columns (weight AND bias, matching
    fairseq's q = q_proj(x) * scaling)."""
    (wq, bq, wk, bk, wv, bv, wo, bo, g1, be1, w1, b1, w2, b2, g2, be2) = params
    scale = HEAD_DIM ** -0.5
    wqkv = jnp.concatenate([wq * scale, wk, wv], axis=1)   # (D, 3D)
    bqkv = jnp.concatenate([bq * scale, bk, bv], axis=1)   # (1, 3D)
    return [wqkv, bqkv, wo, bo, g1, be1, w1, b1, w2, b2, g2, be2]


def reference(x_tbd, params):
    """Pure-JAX reference matching the PyTorch forward (eval mode, no adapters)."""
    (wq, bq, wk, bk, wv, bv, wo, bo, g1, be1, w1, b1, w2, b2, g2, be2) = params
    x = jnp.transpose(x_tbd, (1, 0, 2))                    # (B, T, D)
    B, T, D = x.shape
    residual = x
    scale = HEAD_DIM ** -0.5
    q = (x @ wq + bq) * scale
    k = x @ wk + bk
    v = x @ wv + bv

    def split(a):
        return a.reshape(B, T, NUM_HEADS, HEAD_DIM).transpose(0, 2, 1, 3)

    s = jnp.einsum('bhqd,bhkd->bhqk', split(q), split(k))
    p = jax.nn.softmax(s, axis=-1)
    o = jnp.einsum('bhqk,bhkd->bhqd', p, split(v)).transpose(0, 2, 1, 3).reshape(B, T, D)
    x = residual + (o @ wo + bo)
    x = _layer_norm(x, g1, be1)
    residual = x
    h = jax.nn.relu(x @ w1 + b1)
    x = residual + (h @ w2 + b2)
    x = _layer_norm(x, g2, be2)
    return jnp.transpose(x, (1, 0, 2))


if __name__ == "__main__":
    key = jax.random.PRNGKey(0)
    kx, kp = jax.random.split(key)
    x = jax.random.normal(kx, (SEQ, BATCH, EMBED_DIM), jnp.float32)
    params = init_params(kp)
    fused = fuse_params(params)   # one-time fold: QKV concat + q scaling

    # TODO(synk): suffix_x prefix path, key_padding_mask/attn_mask, and the
    # houlsby/compacter/pfeiffer adapter branches are inactive under the
    # module's default forward arguments and are not implemented here.

    y, attn = transformer_sentence_encoder_layer(x, fused)
    y = jax.block_until_ready(y)

    y_ref = reference(x, params)
    # Tolerance is looser than pure-f32 because the kernel normalizes the
    # softmax with the EUP approximate reciprocal (pl.reciprocal(approx=True));
    # the residual+LayerNorm structure keeps the resulting error well below 5e-3.
    np.testing.assert_allclose(np.asarray(y), np.asarray(y_ref), rtol=5e-3, atol=5e-3)

    print("KERNEL_OK")
</pallas_src>

<mosaic_0001>
module attributes {stable_mosaic.version = 11 : i64} {
  func.func @encoder_layer_kernel(%arg0: i32, %arg1: memref<16x64xf32, #tpu.memory_space<vmem>>, %arg2: memref<64x192xf32, #tpu.memory_space<vmem>>, %arg3: memref<1x192xf32, #tpu.memory_space<vmem>>, %arg4: memref<64x64xf32, #tpu.memory_space<vmem>>, %arg5: memref<1x64xf32, #tpu.memory_space<vmem>>, %arg6: memref<1x64xf32, #tpu.memory_space<vmem>>, %arg7: memref<1x64xf32, #tpu.memory_space<vmem>>, %arg8: memref<64x128xf32, #tpu.memory_space<vmem>>, %arg9: memref<1x128xf32, #tpu.memory_space<vmem>>, %arg10: memref<128x64xf32, #tpu.memory_space<vmem>>, %arg11: memref<1x64xf32, #tpu.memory_space<vmem>>, %arg12: memref<1x64xf32, #tpu.memory_space<vmem>>, %arg13: memref<1x64xf32, #tpu.memory_space<vmem>>, %arg14: memref<16x64xf32, #tpu.memory_space<vmem>>) attributes {dimension_semantics = [#tpu.dimension_semantics<arbitrary>], iteration_bounds = array<i64: 1>, scalar_prefetch = 0 : i64, scratch_operands = 0 : i64, tpu.core_type = #tpu.core_type<tc>, window_params = [{pipeline_mode = #tpu.pipeline_mode<synchronous>, transform_indices = @transform_0, window_bounds = array<i64: 16, 64>}, {pipeline_mode = #tpu.pipeline_mode<synchronous>, transform_indices = @transform_1, window_bounds = array<i64: 64, 192>}, {pipeline_mode = #tpu.pipeline_mode<synchronous>, transform_indices = @transform_2, window_bounds = array<i64: 1, 192>}, {pipeline_mode = #tpu.pipeline_mode<synchronous>, transform_indices = @transform_3, window_bounds = array<i64: 64, 64>}, {pipeline_mode = #tpu.pipeline_mode<synchronous>, transform_indices = @transform_4, window_bounds = array<i64: 1, 64>}, {pipeline_mode = #tpu.pipeline_mode<synchronous>, transform_indices = @transform_5, window_bounds = array<i64: 1, 64>}, {pipeline_mode = #tpu.pipeline_mode<synchronous>, transform_indices = @transform_6, window_bounds = array<i64: 1, 64>}, {pipeline_mode = #tpu.pipeline_mode<synchronous>, transform_indices = @transform_7, window_bounds = array<i64: 64, 128>}, {pipeline_mode = #tpu.pipeline_mode<synchronous>, transform_indices = @transform_8, window_bounds = array<i64: 1, 128>}, {pipeline_mode = #tpu.pipeline_mode<synchronous>, transform_indices = @transform_9, window_bounds = array<i64: 128, 64>}, {pipeline_mode = #tpu.pipeline_mode<synchronous>, transform_indices = @transform_10, window_bounds = array<i64: 1, 64>}, {pipeline_mode = #tpu.pipeline_mode<synchronous>, transform_indices = @transform_11, window_bounds = array<i64: 1, 64>}, {pipeline_mode = #tpu.pipeline_mode<synchronous>, transform_indices = @transform_12, window_bounds = array<i64: 1, 64>}, {pipeline_mode = #tpu.pipeline_mode<synchronous>, transform_indices = @transform_13, window_bounds = array<i64: 16, 64>}]} {
    %c0 = arith.constant 0 : index
    %c0_0 = arith.constant 0 : index
    %0 = vector.load %arg1[%c0, %c0_0] : memref<16x64xf32, #tpu.memory_space<vmem>>, vector<16x64xf32>
    %c0_1 = arith.constant 0 : index
    %c0_2 = arith.constant 0 : index
    %1 = vector.load %arg2[%c0_1, %c0_2] : memref<64x192xf32, #tpu.memory_space<vmem>>, vector<64x192xf32>
    %cst = arith.constant dense<0.000000e+00> : vector<16x192xf32>
    %2 = tpu.matmul %0, %1, %cst {dimension_numbers = #tpu.dot_dimension_numbers<[1], [0], [0], [1], [0, 0, 1, 1], [], []>} : vector<16x64xf32>, vector<64x192xf32>, vector<16x192xf32> -> vector<16x192xf32>
    %c0_3 = arith.constant 0 : index
    %c0_4 = arith.constant 0 : index
    %3 = vector.load %arg3[%c0_3, %c0_4] : memref<1x192xf32, #tpu.memory_space<vmem>>, vector<1x192xf32>
    %4 = vector.broadcast %3 : vector<1x192xf32> to vector<16x192xf32>
    %5 = arith.addf %2, %4 : vector<16x192xf32>
    %6 = tpu.iota {dimensions = array<i32: 0>} : vector<16x16xi32>
    %c2_i32 = arith.constant 2 : i32
    %c0_i32 = arith.constant 0 : i32
    %7 = arith.cmpi eq, %c2_i32, %c0_i32 : i32
    %c1_i32 = arith.constant 1 : i32
    %8 = arith.select %7, %c1_i32, %c2_i32 : i32
    %9 = vector.broadcast %8 : i32 to vector<16x16xi32>
    %10 = arith.remsi %6, %9 : vector<16x16xi32>
    %c0_i32_5 = arith.constant 0 : i32
    %11 = vector.broadcast %c0_i32_5 : i32 to vector<16x16xi32>
    %12 = arith.cmpi ne, %10, %11 : vector<16x16xi32>
    %c0_i32_6 = arith.constant 0 : i32
    %13 = vector.broadcast %c0_i32_6 : i32 to vector<16x16xi32>
    %14 = arith.cmpi slt, %10, %13 : vector<16x16xi32>
    %c0_i32_7 = arith.constant 0 : i32
    %15 = arith.cmpi slt, %8, %c0_i32_7 : i32
    %16 = vector.broadcast %15 : i1 to vector<16x16xi1>
    %17 = vector.broadcast %16 : vector<16x16xi1> to vector<16x16xi1>
    %18 = arith.xori %14, %17 : vector<16x16xi1>
    %19 = arith.andi %18, %12 : vector<16x16xi1>
    %20 = vector.broadcast %8 : i32 to vector<16x16xi32>
    %21 = arith.addi %10, %20 : vector<16x16xi32>
    %22 = arith.select %19, %21, %10 : vector<16x16xi1>, vector<16x16xi32>
    %23 = tpu.iota {dimensions = array<i32: 1>} : vector<16x16xi32>
    %c2_i32_8 = arith.constant 2 : i32
    %c0_i32_9 = arith.constant 0 : i32
    %24 = arith.cmpi eq, %c2_i32_8, %c0_i32_9 : i32
    %c1_i32_10 = arith.constant 1 : i32
    %25 = arith.select %24, %c1_i32_10, %c2_i32_8 : i32
    %26 = vector.broadcast %25 : i32 to vector<16x16xi32>
    %27 = arith.remsi %23, %26 : vector<16x16xi32>
    %c0_i32_11 = arith.constant 0 : i32
    %28 = vector.broadcast %c0_i32_11 : i32 to vector<16x16xi32>
    %29 = arith.cmpi ne, %27, %28 : vector<16x16xi32>
    %c0_i32_12 = arith.constant 0 : i32
    %30 = vector.broadcast %c0_i32_12 : i32 to vector<16x16xi32>
    %31 = arith.cmpi slt, %27, %30 : vector<16x16xi32>
    %c0_i32_13 = arith.constant 0 : i32
    %32 = arith.cmpi slt, %25, %c0_i32_13 : i32
    %33 = vector.broadcast %32 : i1 to vector<16x16xi1>
    %34 = vector.broadcast %33 : vector<16x16xi1> to vector<16x16xi1>
    %35 = arith.xori %31, %34 : vector<16x16xi1>
    %36 = arith.andi %35, %29 : vector<16x16xi1>
    %37 = vector.broadcast %25 : i32 to vector<16x16xi32>
    %38 = arith.addi %27, %37 : vector<16x16xi32>
    %39 = arith.select %36, %38, %27 : vector<16x16xi1>, vector<16x16xi32>
    %40 = arith.cmpi eq, %22, %39 : vector<16x16xi32>
    %c0_14 = arith.constant 0 : index
    %c0_15 = arith.constant 0 : index
    %41 = vector.load %arg4[%c0_14, %c0_15] : memref<64x64xf32, #tpu.memory_space<vmem>>, vector<64x64xf32>
    %42 = vector.extract_strided_slice %5 {offsets = [0, 0], sizes = [16, 16], strides = [1, 1]} : vector<16x192xf32> to vector<16x16xf32>
    %43 = vector.extract_strided_slice %5 {offsets = [0, 64], sizes = [16, 16], strides = [1, 1]} : vector<16x192xf32> to vector<16x16xf32>
    %44 = vector.extract_strided_slice %5 {offsets = [0, 128], sizes = [16, 16], strides = [1, 1]} : vector<16x192xf32> to vector<16x16xf32>
    %45 = tpu.transpose %43, [1, 0] : vector<16x16xf32> -> vector<16x16xf32>
    %cst_16 = arith.constant dense<0.000000e+00> : vector<16x16xf32>
    %46 = tpu.matmul %42, %45, %cst_16 {dimension_numbers = #tpu.dot_dimension_numbers<[1], [0], [0], [1], [0, 0, 1, 1], [], []>} : vector<16x16xf32>, vector<16x16xf32>, vector<16x16xf32> -> vector<16x16xf32>
    %cst_17 = arith.constant -1.000000e+30 : f32
    %47 = vector.broadcast %cst_17 : f32 to vector<16x16xf32>
    %48 = arith.select %40, %46, %47 : vector<16x16xi1>, vector<16x16xf32>
    %cst_18 = arith.constant dense<0xFF800000> : vector<16xf32>
    %49 = vector.multi_reduction <maximumf>, %48, %cst_18 [1] : vector<16x16xf32> to vector<16xf32>
    %50 = vector.shape_cast %49 : vector<16xf32> to vector<16x1xf32>
    %51 = vector.broadcast %50 : vector<16x1xf32> to vector<16x16xf32>
    %52 = arith.subf %48, %51 : vector<16x16xf32>
    %53 = math.exp %52 : vector<16x16xf32>
    %cst_19 = arith.constant dense<0.000000e+00> : vector<16xf32>
    %54 = vector.multi_reduction <add>, %53, %cst_19 [1] : vector<16x16xf32> to vector<16xf32>
    %55 = vector.shape_cast %54 : vector<16xf32> to vector<16x1xf32>
    %56 = tpu.reciprocal %55 {approx = true} : vector<16x1xf32> -> vector<16x1xf32>
    %57 = vector.broadcast %56 : vector<16x1xf32> to vector<16x16xf32>
    %58 = arith.mulf %53, %57 : vector<16x16xf32>
    %cst_20 = arith.constant dense<0.000000e+00> : vector<16x16xf32>
    %59 = tpu.matmul %58, %44, %cst_20 {dimension_numbers = #tpu.dot_dimension_numbers<[1], [0], [0], [1], [0, 0, 1, 1], [], []>} : vector<16x16xf32>, vector<16x16xf32>, vector<16x16xf32> -> vector<16x16xf32>
    %60 = vector.extract_strided_slice %41 {offsets = [0, 0], sizes = [16, 64], strides = [1, 1]} : vector<64x64xf32> to vector<16x64xf32>
    %cst_21 = arith.constant dense<0.000000e+00> : vector<16x64xf32>
    %61 = tpu.matmul %59, %60, %cst_21 {dimension_numbers = #tpu.dot_dimension_numbers<[1], [0], [0], [1], [0, 0, 1, 1], [], []>} : vector<16x16xf32>, vector<16x64xf32>, vector<16x64xf32> -> vector<16x64xf32>
    %62 = vector.extract_strided_slice %5 {offsets = [0, 16], sizes = [16, 16], strides = [1, 1]} : vector<16x192xf32> to vector<16x16xf32>
    %63 = vector.extract_strided_slice %5 {offsets = [0, 80], sizes = [16, 16], strides = [1, 1]} : vector<16x192xf32> to vector<16x16xf32>
    %64 = vector.extract_strided_slice %5 {offsets = [0, 144], sizes = [16, 16], strides = [1, 1]} : vector<16x192xf32> to vector<16x16xf32>
    %65 = tpu.transpose %63, [1, 0] : vector<16x16xf32> -> vector<16x16xf32>
    %cst_22 = arith.constant dense<0.000000e+00> : vector<16x16xf32>
    %66 = tpu.matmul %62, %65, %cst_22 {dimension_numbers = #tpu.dot_dimension_numbers<[1], [0], [0], [1], [0, 0, 1, 1], [], []>} : vector<16x16xf32>, vector<16x16xf32>, vector<16x16xf32> -> vector<16x16xf32>
    %cst_23 = arith.constant -1.000000e+30 : f32
    %67 = vector.broadcast %cst_23 : f32 to vector<16x16xf32>
    %68 = arith.select %40, %66, %67 : vector<16x16xi1>, vector<16x16xf32>
    %cst_24 = arith.constant dense<0xFF800000> : vector<16xf32>
    %69 = vector.multi_reduction <maximumf>, %68, %cst_24 [1] : vector<16x16xf32> to vector<16xf32>
    %70 = vector.shape_cast %69 : vector<16xf32> to vector<16x1xf32>
    %71 = vector.broadcast %70 : vector<16x1xf32> to vector<16x16xf32>
    %72 = arith.subf %68, %71 : vector<16x16xf32>
    %73 = math.exp %72 : vector<16x16xf32>
    %cst_25 = arith.constant dense<0.000000e+00> : vector<16xf32>
    %74 = vector.multi_reduction <add>, %73, %cst_25 [1] : vector<16x16xf32> to vector<16xf32>
    %75 = vector.shape_cast %74 : vector<16xf32> to vector<16x1xf32>
    %76 = tpu.reciprocal %75 {approx = true} : vector<16x1xf32> -> vector<16x1xf32>
    %77 = vector.broadcast %76 : vector<16x1xf32> to vector<16x16xf32>
    %78 = arith.mulf %73, %77 : vector<16x16xf32>
    %cst_26 = arith.constant dense<0.000000e+00> : vector<16x16xf32>
    %79 = tpu.matmul %78, %64, %cst_26 {dimension_numbers = #tpu.dot_dimension_numbers<[1], [0], [0], [1], [0, 0, 1, 1], [], []>} : vector<16x16xf32>, vector<16x16xf32>, vector<16x16xf32> -> vector<16x16xf32>
    %80 = vector.extract_strided_slice %41 {offsets = [16, 0], sizes = [16, 64], strides = [1, 1]} : vector<64x64xf32> to vector<16x64xf32>
    %cst_27 = arith.constant dense<0.000000e+00> : vector<16x64xf32>
    %81 = tpu.matmul %79, %80, %cst_27 {dimension_numbers = #tpu.dot_dimension_numbers<[1], [0], [0], [1], [0, 0, 1, 1], [], []>} : vector<16x16xf32>, vector<16x64xf32>, vector<16x64xf32> -> vector<16x64xf32>
    %82 = arith.addf %61, %81 : vector<16x64xf32>
    %83 = vector.extract_strided_slice %5 {offsets = [0, 32], sizes = [16, 16], strides = [1, 1]} : vector<16x192xf32> to vector<16x16xf32>
    %84 = vector.extract_strided_slice %5 {offsets = [0, 96], sizes = [16, 16], strides = [1, 1]} : vector<16x192xf32> to vector<16x16xf32>
    %85 = vector.extract_strided_slice %5 {offsets = [0, 160], sizes = [16, 16], strides = [1, 1]} : vector<16x192xf32> to vector<16x16xf32>
    %86 = tpu.transpose %84, [1, 0] : vector<16x16xf32> -> vector<16x16xf32>
    %cst_28 = arith.constant dense<0.000000e+00> : vector<16x16xf32>
    %87 = tpu.matmul %83, %86, %cst_28 {dimension_numbers = #tpu.dot_dimension_numbers<[1], [0], [0], [1], [0, 0, 1, 1], [], []>} : vector<16x16xf32>, vector<16x16xf32>, vector<16x16xf32> -> vector<16x16xf32>
    %cst_29 = arith.constant -1.000000e+30 : f32
    %88 = vector.broadcast %cst_29 : f32 to vector<16x16xf32>
    %89 = arith.select %40, %87, %88 : vector<16x16xi1>, vector<16x16xf32>
    %cst_30 = arith.constant dense<0xFF800000> : vector<16xf32>
    %90 = vector.multi_reduction <maximumf>, %89, %cst_30 [1] : vector<16x16xf32> to vector<16xf32>
    %91 = vector.shape_cast %90 : vector<16xf32> to vector<16x1xf32>
    %92 = vector.broadcast %91 : vector<16x1xf32> to vector<16x16xf32>
    %93 = arith.subf %89, %92 : vector<16x16xf32>
    %94 = math.exp %93 : vector<16x16xf32>
    %cst_31 = arith.constant dense<0.000000e+00> : vector<16xf32>
    %95 = vector.multi_reduction <add>, %94, %cst_31 [1] : vector<16x16xf32> to vector<16xf32>
    %96 = vector.shape_cast %95 : vector<16xf32> to vector<16x1xf32>
    %97 = tpu.reciprocal %96 {approx = true} : vector<16x1xf32> -> vector<16x1xf32>
    %98 = vector.broadcast %97 : vector<16x1xf32> to vector<16x16xf32>
    %99 = arith.mulf %94, %98 : vector<16x16xf32>
    %cst_32 = arith.constant dense<0.000000e+00> : vector<16x16xf32>
    %100 = tpu.matmul %99, %85, %cst_32 {dimension_numbers = #tpu.dot_dimension_numbers<[1], [0], [0], [1], [0, 0, 1, 1], [], []>} : vector<16x16xf32>, vector<16x16xf32>, vector<16x16xf32> -> vector<16x16xf32>
    %101 = vector.extract_strided_slice %41 {offsets = [32, 0], sizes = [16, 64], strides = [1, 1]} : vector<64x64xf32> to vector<16x64xf32>
    %cst_33 = arith.constant dense<0.000000e+00> : vector<16x64xf32>
    %102 = tpu.matmul %100, %101, %cst_33 {dimension_numbers = #tpu.dot_dimension_numbers<[1], [0], [0], [1], [0, 0, 1, 1], [], []>} : vector<16x16xf32>, vector<16x64xf32>, vector<16x64xf32> -> vector<16x64xf32>
    %103 = arith.addf %82, %102 : vector<16x64xf32>
    %104 = vector.extract_strided_slice %5 {offsets = [0, 48], sizes = [16, 16], strides = [1, 1]} : vector<16x192xf32> to vector<16x16xf32>
    %105 = vector.extract_strided_slice %5 {offsets = [0, 112], sizes = [16, 16], strides = [1, 1]} : vector<16x192xf32> to vector<16x16xf32>
    %106 = vector.extract_strided_slice %5 {offsets = [0, 176], sizes = [16, 16], strides = [1, 1]} : vector<16x192xf32> to vector<16x16xf32>
    %107 = tpu.transpose %105, [1, 0] : vector<16x16xf32> -> vector<16x16xf32>
    %cst_34 = arith.constant dense<0.000000e+00> : vector<16x16xf32>
    %108 = tpu.matmul %104, %107, %cst_34 {dimension_numbers = #tpu.dot_dimension_numbers<[1], [0], [0], [1], [0, 0, 1, 1], [], []>} : vector<16x16xf32>, vector<16x16xf32>, vector<16x16xf32> -> vector<16x16xf32>
    %cst_35 = arith.constant -1.000000e+30 : f32
    %109 = vector.broadcast %cst_35 : f32 to vector<16x16xf32>
    %110 = arith.select %40, %108, %109 : vector<16x16xi1>, vector<16x16xf32>
    %cst_36 = arith.constant dense<0xFF800000> : vector<16xf32>
    %111 = vector.multi_reduction <maximumf>, %110, %cst_36 [1] : vector<16x16xf32> to vector<16xf32>
    %112 = vector.shape_cast %111 : vector<16xf32> to vector<16x1xf32>
    %113 = vector.broadcast %112 : vector<16x1xf32> to vector<16x16xf32>
    %114 = arith.subf %110, %113 : vector<16x16xf32>
    %115 = math.exp %114 : vector<16x16xf32>
    %cst_37 = arith.constant dense<0.000000e+00> : vector<16xf32>
    %116 = vector.multi_reduction <add>, %115, %cst_37 [1] : vector<16x16xf32> to vector<16xf32>
    %117 = vector.shape_cast %116 : vector<16xf32> to vector<16x1xf32>
    %118 = tpu.reciprocal %117 {approx = true} : vector<16x1xf32> -> vector<16x1xf32>
    %119 = vector.broadcast %118 : vector<16x1xf32> to vector<16x16xf32>
    %120 = arith.mulf %115, %119 : vector<16x16xf32>
    %cst_38 = arith.constant dense<0.000000e+00> : vector<16x16xf32>
    %121 = tpu.matmul %120, %106, %cst_38 {dimension_numbers = #tpu.dot_dimension_numbers<[1], [0], [0], [1], [0, 0, 1, 1], [], []>} : vector<16x16xf32>, vector<16x16xf32>, vector<16x16xf32> -> vector<16x16xf32>
    %122 = vector.extract_strided_slice %41 {offsets = [48, 0], sizes = [16, 64], strides = [1, 1]} : vector<64x64xf32> to vector<16x64xf32>
    %cst_39 = arith.constant dense<0.000000e+00> : vector<16x64xf32>
    %123 = tpu.matmul %121, %122, %cst_39 {dimension_numbers = #tpu.dot_dimension_numbers<[1], [0], [0], [1], [0, 0, 1, 1], [], []>} : vector<16x16xf32>, vector<16x64xf32>, vector<16x64xf32> -> vector<16x64xf32>
    %124 = arith.addf %103, %123 : vector<16x64xf32>
    %c0_40 = arith.constant 0 : index
    %c0_41 = arith.constant 0 : index
    %125 = vector.load %arg5[%c0_40, %c0_41] : memref<1x64xf32, #tpu.memory_space<vmem>>, vector<1x64xf32>
    %126 = vector.broadcast %125 : vector<1x64xf32> to vector<16x64xf32>
    %127 = arith.addf %124, %126 : vector<16x64xf32>
    %128 = arith.addf %0, %127 : vector<16x64xf32>
    %c0_42 = arith.constant 0 : index
    %c0_43 = arith.constant 0 : index
    %129 = vector.load %arg6[%c0_42, %c0_43] : memref<1x64xf32, #tpu.memory_space<vmem>>, vector<1x64xf32>
    %c0_44 = arith.constant 0 : index
    %c0_45 = arith.constant 0 : index
    %130 = vector.load %arg7[%c0_44, %c0_45] : memref<1x64xf32, #tpu.memory_space<vmem>>, vector<1x64xf32>
    %cst_46 = arith.constant dense<0.000000e+00> : vector<16xf32>
    %131 = vector.multi_reduction <add>, %128, %cst_46 [1] : vector<16x64xf32> to vector<16xf32>
    %132 = vector.shape_cast %131 : vector<16xf32> to vector<16x1xf32>
    %cst_47 = arith.constant 6.400000e+01 : f32
    %133 = vector.broadcast %cst_47 : f32 to vector<16x1xf32>
    %134 = arith.divf %132, %133 : vector<16x1xf32>
    %135 = vector.broadcast %134 : vector<16x1xf32> to vector<16x64xf32>
    %136 = arith.subf %128, %135 : vector<16x64xf32>
    %137 = arith.mulf %136, %136 : vector<16x64xf32>
    %cst_48 = arith.constant dense<0.000000e+00> : vector<16xf32>
    %138 = vector.multi_reduction <add>, %137, %cst_48 [1] : vector<16x64xf32> to vector<16xf32>
    %139 = vector.shape_cast %138 : vector<16xf32> to vector<16x1xf32>
    %cst_49 = arith.constant 6.400000e+01 : f32
    %140 = vector.broadcast %cst_49 : f32 to vector<16x1xf32>
    %141 = arith.divf %139, %140 : vector<16x1xf32>
    %142 = vector.broadcast %134 : vector<16x1xf32> to vector<16x64xf32>
    %143 = arith.subf %128, %142 : vector<16x64xf32>
    %cst_50 = arith.constant 9.99999974E-6 : f32
    %144 = vector.broadcast %cst_50 : f32 to vector<16x1xf32>
    %145 = arith.addf %141, %144 : vector<16x1xf32>
    %146 = math.rsqrt %145 : vector<16x1xf32>
    %147 = vector.broadcast %146 : vector<16x1xf32> to vector<16x64xf32>
    %148 = arith.mulf %143, %147 : vector<16x64xf32>
    %149 = vector.broadcast %129 : vector<1x64xf32> to vector<16x64xf32>
    %150 = arith.mulf %148, %149 : vector<16x64xf32>
    %151 = vector.broadcast %130 : vector<1x64xf32> to vector<16x64xf32>
    %152 = arith.addf %150, %151 : vector<16x64xf32>
    %c0_51 = arith.constant 0 : index
    %c0_52 = arith.constant 0 : index
    %153 = vector.load %arg8[%c0_51, %c0_52] : memref<64x128xf32, #tpu.memory_space<vmem>>, vector<64x128xf32>
    %cst_53 = arith.constant dense<0.000000e+00> : vector<16x128xf32>
    %154 = tpu.matmul %152, %153, %cst_53 {dimension_numbers = #tpu.dot_dimension_numbers<[1], [0], [0], [1], [0, 0, 1, 1], [], []>} : vector<16x64xf32>, vector<64x128xf32>, vector<16x128xf32> -> vector<16x128xf32>
    %c0_54 = arith.constant 0 : index
    %c0_55 = arith.constant 0 : index
    %155 = vector.load %arg9[%c0_54, %c0_55] : memref<1x128xf32, #tpu.memory_space<vmem>>, vector<1x128xf32>
    %156 = vector.broadcast %155 : vector<1x128xf32> to vector<16x128xf32>
    %157 = arith.addf %154, %156 : vector<16x128xf32>
    %cst_56 = arith.constant 0.000000e+00 : f32
    %158 = vector.broadcast %cst_56 : f32 to vector<16x128xf32>
    %159 = arith.maximumf %157, %158 : vector<16x128xf32>
    %c0_57 = arith.constant 0 : index
    %c0_58 = arith.constant 0 : index
    %160 = vector.load %arg10[%c0_57, %c0_58] : memref<128x64xf32, #tpu.memory_space<vmem>>, vector<128x64xf32>
    %cst_59 = arith.constant dense<0.000000e+00> : vector<16x64xf32>
    %161 = tpu.matmul %159, %160, %cst_59 {dimension_numbers = #tpu.dot_dimension_numbers<[1], [0], [0], [1], [0, 0, 1, 1], [], []>} : vector<16x128xf32>, vector<128x64xf32>, vector<16x64xf32> -> vector<16x64xf32>
    %c0_60 = arith.constant 0 : index
    %c0_61 = arith.constant 0 : index
    %162 = vector.load %arg11[%c0_60, %c0_61] : memref<1x64xf32, #tpu.memory_space<vmem>>, vector<1x64xf32>
    %163 = vector.broadcast %162 : vector<1x64xf32> to vector<16x64xf32>
    %164 = arith.addf %161, %163 : vector<16x64xf32>
    %165 = arith.addf %152, %164 : vector<16x64xf32>
    %c0_62 = arith.constant 0 : index
    %c0_63 = arith.constant 0 : index
    %166 = vector.load %arg12[%c0_62, %c0_63] : memref<1x64xf32, #tpu.memory_space<vmem>>, vector<1x64xf32>
    %c0_64 = arith.constant 0 : index
    %c0_65 = arith.constant 0 : index
    %167 = vector.load %arg13[%c0_64, %c0_65] : memref<1x64xf32, #tpu.memory_space<vmem>>, vector<1x64xf32>
    %cst_66 = arith.constant dense<0.000000e+00> : vector<16xf32>
    %168 = vector.multi_reduction <add>, %165, %cst_66 [1] : vector<16x64xf32> to vector<16xf32>
    %169 = vector.shape_cast %168 : vector<16xf32> to vector<16x1xf32>
    %cst_67 = arith.constant 6.400000e+01 : f32
    %170 = vector.broadcast %cst_67 : f32 to vector<16x1xf32>
    %171 = arith.divf %169, %170 : vector<16x1xf32>
    %172 = vector.broadcast %171 : vector<16x1xf32> to vector<16x64xf32>
    %173 = arith.subf %165, %172 : vector<16x64xf32>
    %174 = arith.mulf %173, %173 : vector<16x64xf32>
    %cst_68 = arith.constant dense<0.000000e+00> : vector<16xf32>
    %175 = vector.multi_reduction <add>, %174, %cst_68 [1] : vector<16x64xf32> to vector<16xf32>
    %176 = vector.shape_cast %175 : vector<16xf32> to vector<16x1xf32>
    %cst_69 = arith.constant 6.400000e+01 : f32
    %177 = vector.broadcast %cst_69 : f32 to vector<16x1xf32>
    %178 = arith.divf %176, %177 : vector<16x1xf32>
    %179 = vector.broadcast %171 : vector<16x1xf32> to vector<16x64xf32>
    %180 = arith.subf %165, %179 : vector<16x64xf32>
    %cst_70 = arith.constant 9.99999974E-6 : f32
    %181 = vector.broadcast %cst_70 : f32 to vector<16x1xf32>
    %182 = arith.addf %178, %181 : vector<16x1xf32>
    %183 = math.rsqrt %182 : vector<16x1xf32>
    %184 = vector.broadcast %183 : vector<16x1xf32> to vector<16x64xf32>
    %185 = arith.mulf %180, %184 : vector<16x64xf32>
    %186 = vector.broadcast %166 : vector<1x64xf32> to vector<16x64xf32>
    %187 = arith.mulf %185, %186 : vector<16x64xf32>
    %188 = vector.broadcast %167 : vector<1x64xf32> to vector<16x64xf32>
    %189 = arith.addf %187, %188 : vector<16x64xf32>
    %c0_71 = arith.constant 0 : index
    %c0_72 = arith.constant 0 : index
    %190 = vector.load %arg14[%c0_71, %c0_72] : memref<16x64xf32, #tpu.memory_space<vmem>>, vector<16x64xf32>
    tpu.vector_store %arg14[%c0_71, %c0_72], %189 {strides = array<i32>} : memref<16x64xf32, #tpu.memory_space<vmem>>, vector<16x64xf32>,
    return
  }
  func.func @transform_0(%arg0: i32) -> (i32, i32) {
    %c0_i32 = arith.constant 0 : i32
    %c0_i32_0 = arith.constant 0 : i32
    %c0_i32_1 = arith.constant 0 : i32
    return %c0_i32, %c0_i32_0 : i32, i32
  }
  func.func @transform_1(%arg0: i32) -> (i32, i32) {
    %c0_i32 = arith.constant 0 : i32
    %c0_i32_0 = arith.constant 0 : i32
    %c0_i32_1 = arith.constant 0 : i32
    return %c0_i32, %c0_i32_0 : i32, i32
  }
  func.func @transform_2(%arg0: i32) -> (i32, i32) {
    %c0_i32 = arith.constant 0 : i32
    %c0_i32_0 = arith.constant 0 : i32
    %c0_i32_1 = arith.constant 0 : i32
    return %c0_i32, %c0_i32_0 : i32, i32
  }
  func.func @transform_3(%arg0: i32) -> (i32, i32) {
    %c0_i32 = arith.constant 0 : i32
    %c0_i32_0 = arith.constant 0 : i32
    %c0_i32_1 = arith.constant 0 : i32
    return %c0_i32, %c0_i32_0 : i32, i32
  }
  func.func @transform_4(%arg0: i32) -> (i32, i32) {
    %c0_i32 = arith.constant 0 : i32
    %c0_i32_0 = arith.constant 0 : i32
    %c0_i32_1 = arith.constant 0 : i32
    return %c0_i32, %c0_i32_0 : i32, i32
  }
  func.func @transform_5(%arg0: i32) -> (i32, i32) {
    %c0_i32 = arith.constant 0 : i32
    %c0_i32_0 = arith.constant 0 : i32
    %c0_i32_1 = arith.constant 0 : i32
    return %c0_i32, %c0_i32_0 : i32, i32
  }
  func.func @transform_6(%arg0: i32) -> (i32, i32) {
    %c0_i32 = arith.constant 0 : i32
    %c0_i32_0 = arith.constant 0 : i32
    %c0_i32_1 = arith.constant 0 : i32
    return %c0_i32, %c0_i32_0 : i32, i32
  }
  func.func @transform_7(%arg0: i32) -> (i32, i32) {
    %c0_i32 = arith.constant 0 : i32
    %c0_i32_0 = arith.constant 0 : i32
    %c0_i32_1 = arith.constant 0 : i32
    return %c0_i32, %c0_i32_0 : i32, i32
  }
  func.func @transform_8(%arg0: i32) -> (i32, i32) {
    %c0_i32 = arith.constant 0 : i32
    %c0_i32_0 = arith.constant 0 : i32
    %c0_i32_1 = arith.constant 0 : i32
    return %c0_i32, %c0_i32_0 : i32, i32
  }
  func.func @transform_9(%arg0: i32) -> (i32, i32) {
    %c0_i32 = arith.constant 0 : i32
    %c0_i32_0 = arith.constant 0 : i32
    %c0_i32_1 = arith.constant 0 : i32
    return %c0_i32, %c0_i32_0 : i32, i32
  }
  func.func @transform_10(%arg0: i32) -> (i32, i32) {
    %c0_i32 = arith.constant 0 : i32
    %c0_i32_0 = arith.constant 0 : i32
    %c0_i32_1 = arith.constant 0 : i32
    return %c0_i32, %c0_i32_0 : i32, i32
  }
  func.func @transform_11(%arg0: i32) -> (i32, i32) {
    %c0_i32 = arith.constant 0 : i32
    %c0_i32_0 = arith.constant 0 : i32
    %c0_i32_1 = arith.constant 0 : i32
    return %c0_i32, %c0_i32_0 : i32, i32
  }
  func.func @transform_12(%arg0: i32) -> (i32, i32) {
    %c0_i32 = arith.constant 0 : i32
    %c0_i32_0 = arith.constant 0 : i32
    %c0_i32_1 = arith.constant 0 : i32
    return %c0_i32, %c0_i32_0 : i32, i32
  }
  func.func @transform_13(%arg0: i32) -> (i32, i32) {
    %c0_i32 = arith.constant 0 : i32
    %c0_i32_0 = arith.constant 0 : i32
    %c0_i32_1 = arith.constant 0 : i32
    return %c0_i32, %c0_i32_0 : i32, i32
  }
}

</mosaic_0001>

<bundles_post_ra>
// kernel: tpu_custom_call.1
= control target key start
LH: loop header
LB: loop body
LE: loop exit
PB: predicated region body
PF: predicated region fallthrough
CT: control target
= control target key end

     0   :  { %18 = vsyncpa [#allocation3], 0  ;;  %s1594_s0 = inlined_call_operand.hbm [shape: f32[16,64], index: 0, kind: input, shape index: {}]   ;;  %s1595_s1 = inlined_call_operand.vmem [shape: f32[64,192], index: 1, kind: input, shape index: {}]   ;;  %s1596_s2 = inlined_call_operand.hbm [shape: f32[1,192], index: 2, kind: input, shape index: {}]   ;;  %s1597_s3 = inlined_call_operand.vmem [shape: f32[64,64], index: 3, kind: input, shape index: {}]   ;;  %s1598_s4 = inlined_call_operand.vmem [shape: f32[1,64], index: 4, kind: input, shape index: {}]   ;;  %s1599_s5 = inlined_call_operand.vmem [shape: f32[1,64], index: 5, kind: input, shape index: {}]   ;;  %s1600_s6 = inlined_call_operand.vmem [shape: f32[1,64], index: 6, kind: input, shape index: {}]   ;;  %s1601_s7 = inlined_call_operand.hbm [shape: f32[64,128], index: 7, kind: input, shape index: {}]   ;;  %s1602_s8 = inlined_call_operand.vmem [shape: f32[1,128], index: 8, kind: input, shape index: {}]   ;;  %s1603_s9 = inlined_call_operand.vmem [shape: f32[128,64], index: 9, kind: input, shape index: {}]   ;;  %s1604_s10 = inlined_call_operand.vmem [shape: f32[1,64], index: 10, kind: input, shape index: {}]   ;;  %s1605_s11 = inlined_call_operand.vmem [shape: f32[1,64], index: 11, kind: input, shape index: {}]   ;;  %s1606_s12 = inlined_call_operand.vmem [shape: f32[1,64], index: 12, kind: input, shape index: {}]   ;;  %s1607_s13 = inlined_call_operand.hbm [shape: f32[16,64], index: 13, kind: output, shape index: {}]  }
   0x1   :  { %19 = vsyncpa [#allocation6], 0  ;;  %s41_s27 = sshll.u32 %s1596_s2, 4  ;;  %s42_s27 = int_to_ptr.hbm [resolvable:$true] %s41_s27 }
   0x2   :  { %20 = vsyncpa [#allocation4], 0  ;;  %s1182_s28 = smov [#allocation5]   ;;  %s25_s15 = sshll.u32 %s1594_s0, 4  ;;  %s26_s15 = int_to_ptr.hbm [resolvable:$true] %s25_s15 }
   0x3   :  { %s43_s29 = sshll.u32 %s1182_s28, 4  ;;  %s1183_s16 = smov [#allocation2]   ;;  %s44_s29 = int_to_ptr.vmem [resolvable:$true] %s43_s29 }
   0x4   :  { %46 = dma.hbm_to_vmem [thread:$0]  %s42_s27, 32, %s44_s29, [#allocation6]  }
   0x5   :  { %s27_s17 = sshll.u32 %s1183_s16, 4  ;;  %s1184_s18 = smov 128   ;;  %s28_s17 = int_to_ptr.vmem [resolvable:$true] %s27_s17 }
   0x6   :  { %s1185_s19 = smov 8   ;;  %s59_s21 = sshll.u32 %s1601_s7, 4  ;;  %s60_s21 = int_to_ptr.hbm [resolvable:$true] %s59_s21 }
   0x7   :  { %33 = dma.hbm_to_vmem [thread:$0]  %s26_s15, 256, %s28_s17, [#allocation3], %s1184_s18, %s1184_s18, %s1185_s19  }
   0x8   :  { %s1186_s22 = smov [#allocation7]  }
   0x9   :  { %s61_s23 = sshll.u32 %s1186_s22, 4  ;;  %s62_s23 = int_to_ptr.vmem [resolvable:$true] %s61_s23 }
   0xa   :  { %67 = dma.hbm_to_vmem [thread:$0]  %s60_s21, 1024, %s62_s23, [#allocation6], %s1184_s18, %s1184_s18, %s1185_s19  }
   0xb   :  { %1176 = dma.done.wait [#allocation3], 256  }
   0xc   :  { %1177 = vsyncadd [#allocation3], 4294967040 }
   0xd   :  { %1178 = dma.done.wait [#allocation6], 1056  }
   0xe   :  { %1179 = vsyncadd [#allocation6], 4294966240  ;;  %v106_v0 = vld [vmem:[%s1595_s1 + $0x70] sm:$0xff]  ;;  %v104_v1 = vld [vmem:[%s1595_s1 + $0x60] sm:$0xff]  ;;  %vm114_vm0 = vcmask 523264   ;;  %s1187_s20 = smov 64   ;;  %v167_v35 = vlaneseq }
   0xf   :  { %129 = vmatpush.msra.mxu0 %v106_v0  ;;  %v102_v2 = vld [vmem:[%s1595_s1 + $0x50] sm:$0xff]  ;;  %v107_v3 = vld [vmem:[%s1595_s1 + $0x78] sm:$0xff]  ;;  %v105_v4 = vld [vmem:[%s1595_s1 + $0x68] sm:$0xff]  ;;  %s1188_s21 = smov 48   ;;  %s1190_s22 = smov 32   ;;  %vm224_vm1 = vcmask 130048  }
  0x10   :  { %v100_v5 = vld [vmem:[%s1595_s1 + $0x40] sm:$0xff]  ;;  %152 = vmatpush.msra.mxu1 %v107_v3  ;;  %v98_v6 = vld [vmem:[%s1595_s1 + $0x30] sm:$0xff]  ;;  %v103_v7 = vld [vmem:[%s1595_s1 + $0x58] sm:$0xff]  ;;  %s1191_s23 = smov 16   ;;  %s1192_s0 = smov 96   ;;  %v168_v36 = vshrl.u32 %v167_v35, 7 }
  0x11   :  { %130 = vmatpush.msra.mxu0 %v104_v1  ;;  %v101_v8 = vld [vmem:[%s1595_s1 + $0x48] sm:$0xff]  ;;  %v96_v9 = vld [vmem:[%s1595_s1 + $0x20] sm:$0xff]  ;;  %v99_v10 = vld [vmem:[%s1595_s1 + $0x38] sm:$0xff]  ;;  %s1193_s24 = smov 80   ;;  %v195_v37 = vand.u32 127, %v167_v35 }
  0x12   :  { %153 = vmatpush.msra.mxu1 %v105_v4  ;;  %v94_v11 = vld [vmem:[%s1595_s1 + $0x10] sm:$0xff]  ;;  %v97_v12 = vld [vmem:[%s1595_s1 + $0x28] sm:$0xff]  ;;  %v92_v13 = vld [vmem:[%s1595_s1] sm:$0xff]  ;;  %v174_v38 = vand.u32 1, %v168_v36  ;;  %v169_v41 = vadd.s32 8, %v168_v36 }
  0x13   :  { %131 = vmatpush.msra.mxu0 %v102_v2  ;;  %v1323_v14 = vld [vmem:[#allocation2] sm:$0xff]  ;;  %v1327_v15 = vld [vmem:[#allocation2 + $0x8] sm:$0xff]  ;;  %v95_v16 = vld [vmem:[%s1595_s1 + $0x18] sm:$0xff]  ;;  %v200_v39 = vand.u32 1, %v195_v37 }
  0x14   :  { %154 = vmatpush.msra.mxu1 %v103_v7  ;;  %v93_v17 = vld [vmem:[%s1595_s1 + $0x8] sm:$0xff]  ;;  %v108_v19 = vld [vmem:[#allocation5] sm:$0x3]  ;;  %s1189_s1 = smov 112   ;;  %v181_v45 = vand.u32 1, %v169_v41 }
  0x15   :  { %132 = vmatpush.msra.mxu0 %v100_v5  ;;  %v110_v20 = vperm.slane %v108_v19, 0  ;;  %v111_v25 = vperm.slane %v108_v19, 1  ;;  %vm1368_vm2 = vcmp.eq.s32.totalorder %v174_v38, %v200_v39  ;;  %v211_v5 = vld [vmem:[%s1597_s3 + $0x8] sm:$0xff] }
  0x16   :  { %155 = vmatpush.msra.mxu1 %v101_v8  ;;  %vm1375_vm3 = vcmp.eq.s32.totalorder %v181_v45, %v200_v39 }
  0x17   :  { %133 = vmatpush.msra.mxu0 %v98_v6  ;;  %v210_v6 = vld [vmem:[%s1597_s3] sm:$0xff] }
  0x18   :  { %156 = vmatpush.msra.mxu1 %v99_v10 }
  0x19   :  { %134 = vmatpush.msra.mxu0 %v96_v9 }
  0x1a   :  { %157 = vmatpush.msra.mxu1 %v97_v12 }
  0x1b   :  { %135 = vmatpush.msra.mxu0 %v94_v11 }
  0x1c   :  { %158 = vmatpush.msra.mxu1 %v95_v16 }
  0x1d   :  { %136 = vmatpush.msra.mxu0 %v92_v13 }
  0x1e   :  { %962 = vmatmul.msk.f32.vlgmr.msra.gmra.mxu0 %vm114_vm0, %v1323_v14  ;;  %159 = vmatpush.msra.mxu1 %v93_v17 }
  0x1f   :  { %964 = vmatmul.msk.f32.vlgmr.msra.gmra.mxu1 %vm114_vm0, %v1323_v14 }
  0x26   :  { %963 = vmatmul.msk.f32.gmra.mxu0 %vm114_vm0, %v1327_v15 }
  0x27   :  { %965 = vmatmul.msk.f32.gmra.mxu1 %vm114_vm0, %v1327_v15 }
  0x9b   :  { %v138_v18 = vpop.f32.mrf.mxu0 }
  0x9c   :  { %v1341_v23 = vadd.f32 %v138_v18, %v110_v20  ;;  %v161_v24 = vpop.f32.mrf.mxu1 }
  0x9d   :  { %v1351_v27 = vadd.f32 %v161_v24, %v111_v25 }
  0xa3   :  { %v141_v21 = vpop.f32.mrf.mxu0 }
  0xa4   :  { %v142_v22 = vadd.f32 %v141_v21, %v110_v20  ;;  %v164_v26 = vpop.f32.mrf.mxu1 }
  0xa5   :  { %v1353_v28 = vadd.f32 %v164_v26, %v111_v25 }
  0xa6   :  { %222 = vrot.lane.b32.xlu0 %v142_v22, %s1187_s20 }
  0xa7   :  { %1000 = vmatpush.msra.mxu3 %v1353_v28 }
  0xa9   :  { %1001 = vmatpush.msra.mxu3 %v1351_v27 }
  0xae   :  { %220 = vrot.lane.b32.xlu0 %v1341_v23, %s1187_s20 }
  0xb6   :  { %315 = vrot.lane.b32.xlu0 %v142_v22, %s1188_s21 }
  0xbe   :  { %311 = vrot.lane.b32.xlu0 %v142_v22, %s1189_s1 }
  0xc6   :  { %473 = vrot.lane.b32.xlu0 %v142_v22, %s1190_s22 }
  0xce   :  { %602 = vrot.lane.b32.xlu0 %v142_v22, %s1191_s23 }
  0xd6   :  { %467 = vrot.lane.b32.xlu0 %v1341_v23, %s1192_s0 }
  0xde   :  { %598 = vrot.lane.b32.xlu0 %v142_v22, %s1193_s24 }
 0x118   :  { %v223_v29 = vpop.permute.xlu0 %222 }
 0x119   :  { %966 = vmatpush.xpose.msk.msra.mxu2 %vm224_vm1, %v223_v29 }
 0x120   :  { %v221_v30 = vpop.permute.xlu0 %220 }
 0x121   :  { %967 = vmatpush.xpose.msk.msra.mxu2 %vm224_vm1, %v221_v30  ;;  %v1016_v30 = vpack.i.bf16 %v1351_v27, %v1353_v28 }
 0x124   :  { %968 = vmatmul.msk.f32.vlgmr.msra.gmra.mxu2 %vm224_vm1, %v1341_v23 }
 0x125   :  { %300 = vmatpush.msrb.mxu2 %v1353_v28 }
 0x127   :  { %301 = vmatpush.msrb.mxu2 %v1351_v27 }
 0x128   :  { %v316_v31 = vpop.permute.xlu0 %315 }
 0x129   :  { %972 = vmatpush.xpose.msk.msrb.mxu3 %vm224_vm1, %v316_v31 }
 0x12c   :  { %969 = vmatmul.msk.f32.gmra.mxu2 %vm224_vm1, %v142_v22 }
 0x130   :  { %v1365_v32 = vpop.permute.xlu0 %311 }
 0x138   :  { %v474_v33 = vpop.permute.xlu0 %473 }
 0x140   :  { %v603_v34 = vpop.permute.xlu0 %602 }
 0x141   :  { %990 = vmatpush.xpose.msk.msrb.mxu1 %vm224_vm1, %v603_v34 }
 0x148   :  { %v468_v8 = vpop.permute.xlu0 %467 }
 0x150   :  { %v599_v10 = vpop.permute.xlu0 %598 }
 0x1a7   :  { %v250_v42 = vpop.f32.mrf.mxu2 }
 0x1a8   :  { %v256_v43 = vsel %vm1368_vm2, %v250_v42, -1e+30 }
 0x1a9   :  { %v258_v44 = vsel %vm224_vm1, %v256_v43, -inf }
 0x1aa   :  { %259 = vmax.xlane.f32.xlu1 %v258_v44 }
 0x1af   :  { %v253_v47 = vpop.f32.mrf.mxu2 }
 0x1b0   :  { %v257_v48 = vsel %vm1375_vm3, %v253_v47, -1e+30 }
 0x1b1   :  { %v261_v49 = vsel %vm224_vm1, %v257_v48, -inf }
 0x1b2   :  { %262 = vmax.xlane.f32.xlu1 %v261_v49 }
 0x1cb   :  { %313 = vrot.lane.b32.xlu1 %v1341_v23, %s1188_s21 }
 0x1d3   :  { %600 = vrot.lane.b32.xlu1 %v1341_v23, %s1191_s23 }
 0x1db   :  { %469 = vrot.lane.b32.xlu1 %v142_v22, %s1192_s0 }
 0x21d   :  { %v260_v50 = vpop.xlane.xlu1 %259 }
 0x21e   :  { %v264_v51 = vsub.f32 %v256_v43, %v260_v50 }
 0x220   :  { %v266_v52 = vmul.f32 1.442695, %v264_v51 }
 0x222   :  { %1038 = vpow2.f32 %v266_v52 }
 0x225   :  { %v263_v53 = vpop.xlane.xlu1 %262 }
 0x226   :  { %v265_v54 = vsub.f32 %v257_v48, %v263_v53 }
 0x228   :  { %v1039_v55 = vpop.eup %1038  ;;  %v268_v56 = vmul.f32 1.442695, %v265_v54 }
 0x229   :  { %v270_v57 = vsel %vm224_vm1, %v1039_v55, 0.0 }
 0x22a   :  { %1040 = vpow2.f32 %v268_v56  ;;  %271 = vadd.xlane.f32.xlu2 %v270_v57 }
 0x230   :  { %v1041_v58 = vpop.eup %1040 }
 0x231   :  { %v273_v59 = vsel %vm224_vm1, %v1041_v58, 0.0 }
 0x232   :  { %274 = vadd.xlane.f32.xlu2 %v273_v59 }
 0x23d   :  { %v314_v60 = vpop.permute.xlu1 %313 }
 0x23e   :  { %973 = vmatpush.xpose.msk.msrb.mxu3 %vm224_vm1, %v314_v60 }
 0x245   :  { %v601_v61 = vpop.permute.xlu1 %600 }
 0x246   :  { %991 = vmatpush.xpose.msk.msrb.mxu1 %vm224_vm1, %v601_v61 }
 0x24a   :  { %309 = vrot.lane.b32.xlu2 %v1341_v23, %s1189_s1 }
 0x24d   :  { %v470_v21 = vpop.permute.xlu1 %469 }
 0x252   :  { %471 = vrot.lane.b32.xlu2 %v1341_v23, %s1190_s22 }
 0x25a   :  { %596 = vrot.lane.b32.xlu2 %v1341_v23, %s1193_s24 }
 0x29d   :  { %v272_v62 = vpop.xlane.xlu2 %271 }
 0x29e   :  { %1042 = vrcp.f32 %v272_v62 }
 0x2a4   :  { %v1043_v63 = vpop.eup %1042 }
 0x2a5   :  { %v275_v0 = vpop.xlane.xlu2 %274  ;;  %v278_v1 = vmul.f32 %v1043_v63, %v1039_v55 }
 0x2a6   :  { %1044 = vrcp.f32 %v275_v0 }
 0x2a7   :  { %970 = vmatmul.msk.f32.vlgmr.msrb.gmra.mxu2 %vm224_vm1, %v278_v1 }
 0x2ac   :  { %v1045_v2 = vpop.eup %1044 }
 0x2ad   :  { %v310_v3 = vpop.permute.xlu2 %309  ;;  %v279_v4 = vmul.f32 %v1045_v2, %v1041_v58 }
 0x2af   :  { %971 = vmatmul.msk.f32.vlgmr.msra.gmra.mxu3 %vm224_vm1, %v279_v4 }
 0x2b0   :  { %458 = vmatpush.msra.mxu3 %v211_v5 }
 0x2b2   :  { %459 = vmatpush.msra.mxu3 %v210_v6 }
 0x2b5   :  { %v472_v7 = vpop.permute.xlu2 %471 }
 0x2b7   :  { %974 = vmatmul.msk.f32.vlgmr.msrb.gmra.mxu3 %vm224_vm1, %v310_v3 }
 0x2b8   :  { %982 = vmatpush.xpose.msk.msrb.mxu3 %vm224_vm1, %v474_v33 }
 0x2bc   :  { %983 = vmatpush.xpose.msk.msrb.mxu3 %vm224_vm1, %v472_v7 }
 0x2bd   :  { %v597_v9 = vpop.permute.xlu2 %596 }
 0x2be   :  { %992 = vmatmul.msk.f32.vlgmr.msrb.gmra.mxu1 %vm224_vm1, %v597_v9 }
 0x2bf   :  { %975 = vmatmul.msk.f32.gmra.mxu3 %vm224_vm1, %v1365_v32 }
 0x2c6   :  { %993 = vmatmul.msk.f32.gmra.mxu1 %vm224_vm1, %v599_v10 }
 0x32a   :  { %v303_v11 = vpop.f32.mrf.mxu2 }
 0x32b   :  { %980 = vmatmul.msk.f32.vlgmr.msra.gmra.mxu3 %vm224_vm1, %v303_v11 }
 0x332   :  { %v306_v12 = vpop.f32.mrf.mxu3 }
 0x333   :  { %981 = vmatmul.msk.f32.gmra.mxu3 %vm224_vm1, %v306_v12 }
 0x33a   :  { %v342_v13 = vpop.f32.mrf.mxu3 }
 0x33b   :  { %v348_v16 = vsel %vm1368_vm2, %v342_v13, -1e+30  ;;  %984 = vmatmul.msk.f32.vlgmr.msrb.gmra.mxu3 %vm224_vm1, %v468_v8  ;;  %v629_v17 = vpop.f32.mrf.mxu1 }
 0x33c   :  { %v635_v18 = vsel %vm1368_vm2, %v629_v17, -1e+30  ;;  %v350_v19 = vsel %vm224_vm1, %v348_v16, -inf }
 0x33d   :  { %351 = vmax.xlane.f32.xlu2 %v350_v19  ;;  %v637_v20 = vsel %vm224_vm1, %v635_v18, -inf }
 0x33e   :  { %638 = vmax.xlane.f32.xlu0 %v637_v20 }
 0x342   :  { %v345_v22 = vpop.f32.mrf.mxu3 }
 0x343   :  { %v349_v23 = vsel %vm1375_vm3, %v345_v22, -1e+30  ;;  %985 = vmatmul.msk.f32.gmra.mxu3 %vm224_vm1, %v470_v21  ;;  %v632_v25 = vpop.f32.mrf.mxu1 }
 0x344   :  { %v353_v24 = vsel %vm224_vm1, %v349_v23, -inf  ;;  %v636_v26 = vsel %vm1375_vm3, %v632_v25, -1e+30 }
 0x345   :  { %354 = vmax.xlane.f32.xlu1 %v353_v24  ;;  %v640_v29 = vsel %vm224_vm1, %v636_v26, -inf }
 0x34d   :  { %641 = vmax.xlane.f32.xlu1 %v640_v29  ;;  %v212_v29 = vld [vmem:[%s1597_s3 + $0x10] sm:$0xff] }
 0x366   :  { %1017 = vrot.lane.b32.xlu1 %v1016_v30, %s1189_s1 }
 0x36e   :  { %1027 = vrot.lane.b32.xlu1 %v1016_v30, %s1192_s0 }
 0x3ae   :  { %v1432_v31 = vpop.f32.mrf.mxu3 }
 0x3b0   :  { %v352_v32 = vpop.xlane.xlu2 %351 }
 0x3b1   :  { %v356_v33 = vsub.f32 %v348_v16, %v352_v32  ;;  %v639_v34 = vpop.xlane.xlu0 %638 }
 0x3b2   :  { %v643_v36 = vsub.f32 %v635_v18, %v639_v34 }
 0x3b3   :  { %v358_v35 = vmul.f32 1.442695, %v356_v33  ;;  %v216_v33 = vld [vmem:[%s1597_s3 + $0x30] sm:$0xff] }
 0x3b4   :  { %v645_v38 = vmul.f32 1.442695, %v643_v36 }
 0x3b5   :  { %1046 = vpow2.f32 %v358_v35 }
 0x3b6   :  { %v1434_v37 = vpop.f32.mrf.mxu3  ;;  %1048 = vpow2.f32 %v645_v38 }
 0x3b8   :  { %v355_v39 = vpop.xlane.xlu1 %354 }
 0x3b9   :  { %v357_v42 = vsub.f32 %v349_v23, %v355_v39  ;;  %v215_v39 = vld [vmem:[%s1597_s3 + $0x28] sm:$0xff] }
 0x3bb   :  { %v1047_v41 = vpop.eup %1046  ;;  %v360_v47 = vmul.f32 1.442695, %v357_v42 }
 0x3bc   :  { %v362_v27 = vsel %vm224_vm1, %v1047_v41, 0.0  ;;  %v1440_v45 = vpop.eup %1048 }
 0x3bd   :  { %363 = vadd.xlane.f32.xlu0 %v362_v27  ;;  %v649_v49 = vsel %vm224_vm1, %v1440_v45, 0.0  ;;  %1050 = vpow2.f32 %v360_v47 }
 0x3be   :  { %v500_v28 = vpop.f32.mrf.mxu3 }
 0x3bf   :  { %v506_v43 = vsel %vm1368_vm2, %v500_v28, -1e+30 }
 0x3c0   :  { %v508_v44 = vsel %vm224_vm1, %v506_v43, -inf  ;;  %v642_v48 = vpop.xlane.xlu1 %641 }
 0x3c1   :  { %509 = vmax.xlane.f32.xlu2 %v508_v44  ;;  %v644_v51 = vsub.f32 %v636_v26, %v642_v48  ;;  %v213_v26 = vld [vmem:[%s1597_s3 + $0x18] sm:$0xff] }
 0x3c2   :  { %429 = vmatpush.msrb.mxu0 %v213_v26 }
 0x3c3   :  { %v647_v53 = vmul.f32 1.442695, %v644_v51  ;;  %v1051_v54 = vpop.eup %1050 }
 0x3c4   :  { %v365_v55 = vsel %vm224_vm1, %v1051_v54, 0.0  ;;  %430 = vmatpush.msrb.mxu0 %v212_v29  ;;  %v854_v29 = vld [vmem:[%s1603_s9 + $0x78] sm:$0xff] }
 0x3c5   :  { %650 = vadd.xlane.f32.xlu0 %v649_v49  ;;  %1052 = vpow2.f32 %v647_v53  ;;  %v1031_v53 = vld [vmem:[%s1598_s4] ss:$0 sm:$0xff]  ;;  %859 = vmatpush.msra.mxu1 %v854_v29  ;;  %s948_s4 = sshll.u32 %s1607_s13, 4  ;;  %s949_s4 = int_to_ptr.hbm [resolvable:$true] %s948_s4 }
 0x3c6   :  { %v503_v50 = vpop.f32.mrf.mxu3  ;;  %585 = vmatpush.msra.mxu0 %v215_v39  ;;  %v850_v39 = vld [vmem:[%s1603_s9 + $0x58] sm:$0xff] }
 0x3c7   :  { %v507_v52 = vsel %vm1375_vm3, %v503_v50, -1e+30 }
 0x3c8   :  { %v511_v40 = vsel %vm224_vm1, %v507_v52, -inf }
 0x3c9   :  { %512 = vmax.xlane.f32.xlu2 %v511_v40 }
 0x3cb   :  { %v1053_v56 = vpop.eup %1052 }
 0x3cc   :  { %v652_v58 = vsel %vm224_vm1, %v1053_v56, 0.0 }
 0x3d1   :  { %366 = vadd.xlane.f32.xlu2 %v365_v55 }
 0x3d8   :  { %v1018_v57 = vpop.permute.xlu1 %1017 }
 0x3d9   :  { %v1019_v59 = vunpack.i.l.bf16 %v1018_v57  ;;  %653 = vadd.xlane.f32.xlu2 %v652_v58  ;;  %1022 = vrot.lane.b32.xlu0 %v1016_v30, %s1193_s24  ;;  %v1020_v60 = vunpack.i.h.bf16 %v1018_v57  ;;  %v217_v30 = vld [vmem:[%s1597_s3 + $0x38] sm:$0xff] }
 0x3db   :  { %400 = vmatpush.msra.mxu2 %v1019_v59 }
 0x3dd   :  { %401 = vmatpush.msra.mxu2 %v1020_v60 }
 0x3e0   :  { %v1028_v46 = vpop.permute.xlu1 %1027 }
 0x3e1   :  { %v1029_v61 = vunpack.i.l.bf16 %v1028_v46  ;;  %v1030_v62 = vunpack.i.h.bf16 %v1028_v46 }
 0x3e3   :  { %556 = vmatpush.msrb.mxu2 %v1029_v61 }
 0x3e5   :  { %557 = vmatpush.msrb.mxu2 %v1030_v62 }
 0x430   :  { %v364_v63 = vpop.xlane.xlu0 %363 }
 0x431   :  { %1054 = vrcp.f32 %v364_v63 }
 0x434   :  { %v510_v0 = vpop.xlane.xlu2 %509 }
 0x435   :  { %v514_v1 = vsub.f32 %v506_v43, %v510_v0  ;;  %v1194_v0 = vmov 64.0  }
 0x437   :  { %v1055_v2 = vpop.eup %1054  ;;  %v516_v3 = vmul.f32 1.442695, %v514_v1 }
 0x438   :  { %v370_v4 = vmul.f32 %v1055_v2, %v1047_v41  ;;  %v651_v10 = vpop.xlane.xlu0 %650  ;;  %v214_v41 = vld [vmem:[%s1597_s3 + $0x20] sm:$0xff] }
 0x439   :  { %1056 = vpow2.f32 %v516_v3  ;;  %586 = vmatpush.msra.mxu0 %v214_v41 }
 0x43a   :  { %976 = vmatmul.msk.f32.vlgmr.msra.gmra.mxu2 %vm224_vm1, %v370_v4 }
 0x43b   :  { %714 = vmatpush.msra.mxu2 %v217_v30  ;;  %v853_v30 = vld [vmem:[%s1603_s9 + $0x70] sm:$0xff] }
 0x43c   :  { %v513_v5 = vpop.xlane.xlu2 %512  ;;  %860 = vmatpush.msra.mxu1 %v853_v30 }
 0x43d   :  { %v515_v6 = vsub.f32 %v507_v52, %v513_v5  ;;  %715 = vmatpush.msra.mxu2 %v216_v33 }
 0x43f   :  { %v1057_v7 = vpop.eup %1056  ;;  %v518_v8 = vmul.f32 1.442695, %v515_v6 }
 0x440   :  { %v520_v9 = vsel %vm224_vm1, %v1057_v7, 0.0 }
 0x441   :  { %1058 = vpow2.f32 %v518_v8  ;;  %521 = vadd.xlane.f32.xlu2 %v520_v9 }
 0x444   :  { %v367_v11 = vpop.xlane.xlu2 %366 }
 0x445   :  { %1060 = vrcp.f32 %v367_v11 }
 0x446   :  { %1062 = vrcp.f32 %v651_v10 }
 0x447   :  { %v1059_v12 = vpop.eup %1058 }
 0x448   :  { %v523_v13 = vsel %vm224_vm1, %v1059_v12, 0.0 }
 0x449   :  { %524 = vadd.xlane.f32.xlu2 %v523_v13 }
 0x44b   :  { %v1061_v16 = vpop.eup %1060  ;;  %v1023_v17 = vpop.permute.xlu0 %1022 }
 0x44c   :  { %v1063_v18 = vpop.eup %1062  ;;  %v1024_v19 = vunpack.i.l.bf16 %v1023_v17  ;;  %v654_v20 = vpop.xlane.xlu2 %653  ;;  %v371_v21 = vmul.f32 %v1061_v16, %v1051_v54  ;;  %v1025_v22 = vunpack.i.h.bf16 %v1023_v17  ;;  %v803_v16 = vld [vmem:[#allocation7 + $0x38] sm:$0xff]  ;;  %v802_v17 = vld [vmem:[#allocation7 + $0x30] sm:$0xff] }
 0x44d   :  { %1064 = vrcp.f32 %v654_v20  ;;  %v657_v23 = vmul.f32 %v1063_v18, %v1440_v45  ;;  %v801_v18 = vld [vmem:[#allocation7 + $0x28] sm:$0xff]  ;;  %v799_v20 = vld [vmem:[#allocation7 + $0x18] sm:$0xff] }
 0x44e   :  { %977 = vmatmul.msk.f32.gmra.mxu2 %vm224_vm1, %v371_v21  ;;  %685 = vmatpush.msra.mxu3 %v1024_v19  ;;  %v800_v19 = vld [vmem:[#allocation7 + $0x20] sm:$0xff]  ;;  %v798_v21 = vld [vmem:[#allocation7 + $0x10] sm:$0xff] }
 0x450   :  { %686 = vmatpush.msra.mxu3 %v1025_v22  ;;  %v797_v22 = vld [vmem:[#allocation7 + $0x8] sm:$0xff] }
 0x451   :  { %994 = vmatmul.msk.f32.vlgmr.msra.gmra.mxu3 %vm224_vm1, %v657_v23  ;;  %v796_v23 = vld [vmem:[#allocation7] sm:$0xff] }
 0x453   :  { %v1065_v24 = vpop.eup %1064 }
 0x454   :  { %v658_v25 = vmul.f32 %v1065_v24, %v1053_v56 }
 0x459   :  { %995 = vmatmul.msk.f32.gmra.mxu3 %vm224_vm1, %v658_v25 }
 0x4b4   :  { %v522_v32 = vpop.xlane.xlu2 %521 }
 0x4b5   :  { %1066 = vrcp.f32 %v522_v32  ;;  %v852_v32 = vld [vmem:[%s1603_s9 + $0x68] sm:$0xff] }
 0x4b6   :  { %861 = vmatpush.msra.mxu1 %v852_v32 }
 0x4bb   :  { %v1067_v34 = vpop.eup %1066 }
 0x4bc   :  { %v528_v35 = vmul.f32 %v1067_v34, %v1057_v7  ;;  %v525_v36 = vpop.xlane.xlu2 %524 }
 0x4bd   :  { %1068 = vrcp.f32 %v525_v36  ;;  %v403_v38 = vpop.f32.mrf.mxu2 }
 0x4be   :  { %978 = vmatmul.msk.f32.vlgmr.msrb.gmra.mxu0 %vm224_vm1, %v403_v38  ;;  %986 = vmatmul.msk.f32.vlgmr.msrb.gmra.mxu2 %vm224_vm1, %v528_v35  ;;  %1070 = vrcp.f32 %v1194_v0  ;;  %v851_v35 = vld [vmem:[%s1603_s9 + $0x60] sm:$0xff] }
 0x4bf   :  { %822 = vmatpush.msrb.mxu0 %v803_v16  ;;  %862 = vmatpush.msra.mxu1 %v851_v35 }
 0x4c1   :  { %823 = vmatpush.msrb.mxu0 %v802_v17  ;;  %863 = vmatpush.msra.mxu1 %v850_v39 }
 0x4c3   :  { %v1069_v27 = vpop.eup %1068  ;;  %824 = vmatpush.msrb.mxu0 %v801_v18 }
 0x4c4   :  { %v529_v28 = vmul.f32 %v1069_v27, %v1059_v12  ;;  %v1071_v1 = vpop.eup %1070  ;;  %v849_v27 = vld [vmem:[%s1603_s9 + $0x50] sm:$0xff] }
 0x4c5   :  { %v742_v2 = vmul.f32 64.0, %v1071_v1  ;;  %vm746_vm4 = vweird.f32 %v1071_v1  ;;  %825 = vmatpush.msrb.mxu0 %v800_v19  ;;  %864 = vmatpush.msra.mxu1 %v849_v27 }
 0x4c6   :  { %987 = vmatmul.msk.f32.gmra.mxu2 %vm224_vm1, %v529_v28 }
 0x4c7   :  { %826 = vmatpush.msrb.mxu0 %v799_v20 }
 0x4c9   :  { %827 = vmatpush.msrb.mxu0 %v798_v21 }
 0x4cb   :  { %828 = vmatpush.msrb.mxu0 %v797_v22 }
 0x4cd   :  { %829 = vmatpush.msrb.mxu0 %v796_v23 }
 0x4d1   :  { %v406_v42 = vpop.f32.mrf.mxu2 }
 0x4d2   :  { %979 = vmatmul.msk.f32.gmra.mxu0 %vm224_vm1, %v406_v42  ;;  %v848_v42 = vld [vmem:[%s1603_s9 + $0x48] sm:$0xff] }
 0x4d3   :  { %865 = vmatpush.msra.mxu1 %v848_v42 }
 0x4d4   :  { %v688_v43 = vpop.f32.mrf.mxu3 }
 0x4d5   :  { %996 = vmatmul.msk.f32.vlgmr.msra.gmra.mxu2 %vm224_vm1, %v688_v43 }
 0x4dc   :  { %v691_v44 = vpop.f32.mrf.mxu3 }
 0x4dd   :  { %997 = vmatmul.msk.f32.gmra.mxu2 %vm224_vm1, %v691_v44  ;;  %v847_v44 = vld [vmem:[%s1603_s9 + $0x40] sm:$0xff] }
 0x4de   :  { %866 = vmatpush.msra.mxu1 %v847_v44 }
 0x53b   :  { %v432_v48 = vpop.f32.mrf.mxu0 }
 0x53c   :  { %v462_v50 = vadd.f32 %v1432_v31, %v432_v48  ;;  %v846_v48 = vld [vmem:[%s1603_s9 + $0x38] sm:$0xff] }
 0x53d   :  { %867 = vmatpush.msra.mxu1 %v846_v48 }
 0x541   :  { %v559_v45 = vpop.f32.mrf.mxu2 }
 0x542   :  { %988 = vmatmul.msk.f32.vlgmr.msra.gmra.mxu0 %vm224_vm1, %v559_v45 }
 0x549   :  { %v562_v47 = vpop.f32.mrf.mxu2 }
 0x54a   :  { %989 = vmatmul.msk.f32.gmra.mxu0 %vm224_vm1, %v562_v47 }
 0x54f   :  { %v435_v49 = vpop.f32.mrf.mxu0 }
 0x550   :  { %v465_v56 = vadd.f32 %v1434_v37, %v435_v49  ;;  %v743_v37 = vsub.f32 1.0, %v742_v2  ;;  %v841_v2 = vld [vmem:[%s1603_s9 + $0x10] sm:$0xff] }
 0x552   :  { %v744_v3 = vmul.f32 %v1071_v1, %v743_v37  ;;  %v840_v37 = vld [vmem:[%s1603_s9 + $0x8] sm:$0xff] }
 0x558   :  { %v717_v51 = vpop.f32.mrf.mxu2 }
 0x560   :  { %v720_v46 = vpop.f32.mrf.mxu2 }
 0x5bf   :  { %v588_v52 = vpop.f32.mrf.mxu0 }
 0x5c0   :  { %v594_v40 = vadd.f32 %v588_v52, %v462_v50  ;;  %v845_v52 = vld [vmem:[%s1603_s9 + $0x30] sm:$0xff] }
 0x5c1   :  { %868 = vmatpush.msra.mxu1 %v845_v52  ;;  %v1037_v52 = vld [vmem:[%s1606_s12] ss:$0 sm:$0xff] }
 0x5c2   :  { %v723_v54 = vadd.f32 %v717_v51, %v594_v40  ;;  %v1032_v51 = vld [vmem:[%s1599_s5] ss:$0 sm:$0xff] }
 0x5c4   :  { %v729_v55 = vadd.f32 %v1031_v53, %v723_v54 }
 0x5c6   :  { %v731_v57 = vadd.f32 %v729_v55, %v1323_v14  ;;  %v745_v14 = vadd.f32 %v1071_v1, %v744_v3  ;;  %v1033_v55 = vld [vmem:[%s1600_s6] ss:$0 sm:$0xff] }
 0x5c7   :  { %v591_v58 = vpop.f32.mrf.mxu0  ;;  %v839_v3 = vld [vmem:[%s1603_s9] sm:$0xff] }
 0x5c8   :  { %v595_v59 = vadd.f32 %v591_v58, %v465_v56  ;;  %v735_v60 = vsel %vm114_vm0, %v731_v57, 0.0  ;;  %v1492_v4 = vsel %vm746_vm4, %v1071_v1, %v745_v14  ;;  %v844_v56 = vld [vmem:[%s1603_s9 + $0x28] sm:$0xff]  ;;  %v1034_v14 = vld [vmem:[%s1602_s8] ss:$0 sm:$0xff] }
 0x5c9   :  { %736 = vadd.xlane.f32.xlu1 %v735_v60  ;;  %869 = vmatpush.msra.mxu1 %v844_v56 }
 0x5ca   :  { %v724_v31 = vadd.f32 %v720_v46, %v595_v59  ;;  %v843_v59 = vld [vmem:[%s1603_s9 + $0x20] sm:$0xff] }
 0x5cb   :  { %870 = vmatpush.msra.mxu1 %v843_v59 }
 0x5cc   :  { %v730_v61 = vadd.f32 %v1031_v53, %v724_v31  ;;  %v842_v31 = vld [vmem:[%s1603_s9 + $0x18] sm:$0xff] }
 0x5cd   :  { %871 = vmatpush.msra.mxu1 %v842_v31 }
 0x5ce   :  { %v732_v62 = vadd.f32 %v730_v61, %v1327_v15 }
 0x5cf   :  { %872 = vmatpush.msra.mxu1 %v841_v2 }
 0x5d0   :  { %v738_v63 = vsel %vm114_vm0, %v732_v62, 0.0 }
 0x5d1   :  { %739 = vadd.xlane.f32.xlu0 %v738_v63  ;;  %873 = vmatpush.msra.mxu1 %v840_v37 }
 0x5d3   :  { %874 = vmatpush.msra.mxu1 %v839_v3 }
 0x63c   :  { %v737_v5 = vpop.xlane.xlu1 %736 }
 0x63d   :  { %v748_v6 = vmul.f32 %v1492_v4, %v737_v5 }
 0x63f   :  { %v1495_v7 = vsub.f32 %v731_v57, %v748_v6 }
 0x641   :  { %v752_v15 = vmul.f32 %v1495_v7, %v1495_v7 }
 0x643   :  { %v754_v8 = vsel %vm114_vm0, %v752_v15, 0.0 }
 0x644   :  { %755 = vadd.xlane.f32.xlu2 %v754_v8  ;;  %v740_v9 = vpop.xlane.xlu0 %739 }
 0x645   :  { %v749_v10 = vmul.f32 %v1492_v4, %v740_v9 }
 0x647   :  { %v1501_v11 = vsub.f32 %v732_v62, %v749_v10  ;;  %v1035_v10 = vld [vmem:[%s1604_s10] ss:$0 sm:$0xff] }
 0x649   :  { %v753_v12 = vmul.f32 %v1501_v11, %v1501_v11 }
 0x64b   :  { %v757_v13 = vsel %vm114_vm0, %v753_v12, 0.0 }
 0x64c   :  { %758 = vadd.xlane.f32.xlu2 %v757_v13 }
 0x6b7   :  { %v756_v24 = vpop.xlane.xlu2 %755 }
 0x6b8   :  { %v760_v25 = vmul.f32 %v756_v24, %v1492_v4 }
 0x6ba   :  { %v762_v26 = vadd.f32 1e-05, %v760_v25 }
 0x6bc   :  { %1072 = vrsqrt.f32 %v762_v26  ;;  %vm770_vm6 = vweird.f32 %v762_v26 }
 0x6bf   :  { %v759_v33 = vpop.xlane.xlu2 %758 }
 0x6c0   :  { %v761_v34 = vmul.f32 %v759_v33, %v1492_v4 }
 0x6c2   :  { %v1073_v36 = vpop.eup %1072  ;;  %v763_v38 = vadd.f32 1e-05, %v761_v34 }
 0x6c3   :  { %v765_v41 = vmul.f32 %v1073_v36, %v762_v26  ;;  %vm771_vm5 = vweird.f32 %v1073_v36 }
 0x6c4   :  { %1074 = vrsqrt.f32 %v763_v38  ;;  %vm772_vm7 = vmor %vm770_vm6, %vm771_vm5  ;;  %vm780_vm9 = vweird.f32 %v763_v38 }
 0x6c5   :  { %v766_v28 = vmul.f32 %v1073_v36, %v765_v41 }
 0x6c7   :  { %v767_v43 = vmul.f32 0.5, %v766_v28 }
 0x6c9   :  { %v768_v45 = vsub.f32 1.5, %v767_v43 }
 0x6ca   :  { %v1075_v47 = vpop.eup %1074 }
 0x6cb   :  { %v769_v49 = vmul.f32 %v1073_v36, %v768_v45  ;;  %v775_v50 = vmul.f32 %v1075_v47, %v763_v38  ;;  %vm781_vm8 = vweird.f32 %v1075_v47 }
 0x6cc   :  { %vm782_vm10 = vmor %vm780_vm9, %vm781_vm8 }
 0x6cd   :  { %v773_v40 = vsel %vm772_vm7, %v1073_v36, %v769_v49  ;;  %v776_v53 = vmul.f32 %v1075_v47, %v775_v50  ;;  %v1036_v49 = vld [vmem:[%s1605_s11] ss:$0 sm:$0xff]  ;;  %s1195_s11 = smov [#allocation8]  }
 0x6ce   :  { %v784_v54 = vmul.f32 %v773_v40, %v1495_v7  ;;  %s946_s22 = sshll.u32 %s1195_s11, 4  ;;  %s947_s22 = int_to_ptr.vmem [resolvable:$true] %s946_s22 }
 0x6cf   :  { %v777_v57 = vmul.f32 0.5, %v776_v53 }
 0x6d0   :  { %v789_v58 = vmul.f32 %v1032_v51, %v784_v54 }
 0x6d1   :  { %v778_v60 = vsub.f32 1.5, %v777_v57 }
 0x6d2   :  { %v794_v46 = vadd.f32 %v1033_v55, %v789_v58 }
 0x6d3   :  { %v779_v61 = vmul.f32 %v1075_v47, %v778_v60 }
 0x6d4   :  { %998 = vmatmul.msk.f32.vlgmr.msrb.gmra.mxu0 %vm114_vm0, %v794_v46 }
 0x6d5   :  { %v783_v62 = vsel %vm782_vm10, %v1075_v47, %v779_v61 }
 0x6d6   :  { %v785_v63 = vmul.f32 %v783_v62, %v1501_v11 }
 0x6d8   :  { %v790_v0 = vmul.f32 %v1032_v51, %v785_v63 }
 0x6da   :  { %v795_v1 = vadd.f32 %v1033_v55, %v790_v0 }
 0x6dc   :  { %999 = vmatmul.msk.f32.gmra.mxu0 %vm114_vm0, %v795_v1 }
 0x751   :  { %v831_v5 = vpop.f32.mrf.mxu0 }
 0x752   :  { %v832_v6 = vadd.f32 %v1034_v14, %v831_v5 }
 0x754   :  { %v837_v7 = vmax.f32 %v832_v6, 0.0 }
 0x756   :  { %875 = vmatmul.f32.vlgmr.msra.gmra.mxu1 %v837_v7 }
 0x759   :  { %v834_v15 = vpop.f32.mrf.mxu0 }
 0x75a   :  { %v835_v8 = vadd.f32 %v1034_v14, %v834_v15 }
 0x75c   :  { %v838_v9 = vmax.f32 %v835_v8, 0.0 }
 0x75e   :  { %878 = vmatmul.f32.gmra.mxu1 %v838_v9 }
 0x7d3   :  { %v876_v11 = vpop.f32.mrf.mxu1 }
 0x7d4   :  { %v877_v12 = vadd.f32 %v1035_v10, %v876_v11 }
 0x7d6   :  { %v882_v13 = vadd.f32 %v877_v12, %v794_v46 }
 0x7d8   :  { %v886_v16 = vsel %vm114_vm0, %v882_v13, 0.0 }
 0x7d9   :  { %887 = vadd.xlane.f32.xlu2 %v886_v16 }
 0x7db   :  { %v879_v17 = vpop.f32.mrf.mxu1 }
 0x7dc   :  { %v880_v18 = vadd.f32 %v1035_v10, %v879_v17 }
 0x7de   :  { %v883_v19 = vadd.f32 %v880_v18, %v795_v1 }
 0x7e0   :  { %v889_v20 = vsel %vm114_vm0, %v883_v19, 0.0 }
 0x7e1   :  { %890 = vadd.xlane.f32.xlu2 %v889_v20 }
 0x84c   :  { %v888_v21 = vpop.xlane.xlu2 %887 }
 0x84d   :  { %v892_v22 = vmul.f32 %v888_v21, %v1492_v4 }
 0x84f   :  { %v894_v23 = vsub.f32 %v882_v13, %v892_v22 }
 0x851   :  { %v896_v24 = vmul.f32 %v894_v23, %v894_v23 }
 0x853   :  { %v898_v25 = vsel %vm114_vm0, %v896_v24, 0.0 }
 0x854   :  { %899 = vadd.xlane.f32.xlu2 %v898_v25  ;;  %v891_v26 = vpop.xlane.xlu2 %890 }
 0x855   :  { %v893_v29 = vmul.f32 %v891_v26, %v1492_v4 }
 0x857   :  { %v895_v30 = vsub.f32 %v883_v19, %v893_v29 }
 0x859   :  { %v897_v32 = vmul.f32 %v895_v30, %v895_v30 }
 0x85b   :  { %v901_v33 = vsel %vm114_vm0, %v897_v32, 0.0 }
 0x85c   :  { %902 = vadd.xlane.f32.xlu1 %v901_v33 }
 0x8c7   :  { %v900_v34 = vpop.xlane.xlu2 %899 }
 0x8c8   :  { %v904_v35 = vmul.f32 %v900_v34, %v1492_v4 }
 0x8ca   :  { %v906_v36 = vadd.f32 1e-05, %v904_v35 }
 0x8cc   :  { %1076 = vrsqrt.f32 %v906_v36  ;;  %vm914_vm12 = vweird.f32 %v906_v36 }
 0x8cf   :  { %v903_v38 = vpop.xlane.xlu1 %902 }
 0x8d0   :  { %v905_v39 = vmul.f32 %v903_v38, %v1492_v4 }
 0x8d2   :  { %v1077_v41 = vpop.eup %1076  ;;  %v907_v27 = vadd.f32 1e-05, %v905_v39 }
 0x8d3   :  { %v909_v28 = vmul.f32 %v1077_v41, %v906_v36  ;;  %vm915_vm11 = vweird.f32 %v1077_v41 }
 0x8d4   :  { %1078 = vrsqrt.f32 %v907_v27  ;;  %vm916_vm13 = vmor %vm914_vm12, %vm915_vm11  ;;  %vm924_vm15 = vweird.f32 %v907_v27 }
 0x8d5   :  { %v910_v42 = vmul.f32 %v1077_v41, %v909_v28 }
 0x8d7   :  { %v911_v43 = vmul.f32 0.5, %v910_v42 }
 0x8d9   :  { %v912_v44 = vsub.f32 1.5, %v911_v43 }
 0x8da   :  { %v1079_v45 = vpop.eup %1078 }
 0x8db   :  { %v913_v47 = vmul.f32 %v1077_v41, %v912_v44  ;;  %v919_v48 = vmul.f32 %v1079_v45, %v907_v27  ;;  %vm925_vm14 = vweird.f32 %v1079_v45 }
 0x8dc   :  { %vm926_vm1 = vmor %vm924_vm15, %vm925_vm14 }
 0x8dd   :  { %v917_v50 = vsel %vm916_vm13, %v1077_v41, %v913_v47  ;;  %v920_v51 = vmul.f32 %v1079_v45, %v919_v48 }
 0x8de   :  { %v928_v4 = vmul.f32 %v917_v50, %v894_v23 }
 0x8df   :  { %v921_v40 = vmul.f32 0.5, %v920_v51 }
 0x8e0   :  { %v933_v53 = vmul.f32 %v1036_v49, %v928_v4 }
 0x8e1   :  { %v922_v54 = vsub.f32 1.5, %v921_v40 }
 0x8e2   :  { %v938_v55 = vadd.f32 %v1037_v52, %v933_v53 }
 0x8e3   :  { %v923_v56 = vmul.f32 %v1079_v45, %v922_v54 }
 0x8e4   :  { %940 = vst.msk [vmem:[#allocation8] sm:$0xff] %vm114_vm0, %v938_v55 }
 0x8e5   :  { %v927_v57 = vsel %vm926_vm1, %v1079_v45, %v923_v56 }
 0x8e6   :  { %v929_v58 = vmul.f32 %v927_v57, %v895_v30 }
 0x8e8   :  { %v934_v59 = vmul.f32 %v1036_v49, %v929_v58 }
 0x8ea   :  { %v939_v60 = vadd.f32 %v1037_v52, %v934_v59 }
 0x8ec   :  { %941 = vst.msk [vmem:[#allocation8 + $0x8] sm:$0xff] %vm114_vm0, %v939_v60 }
 0x8ed   :  { %954 = dma.vmem_to_hbm [thread:$0]  %s947_s22, 256, %s949_s4, [#allocation4], %s1184_s18, %s1184_s18, %s1185_s19  }
 0x8ee   :  { %1180 = dma.done.wait [#allocation4], 256  }
 0x8ef   :  { %1181 = vsyncadd [#allocation4], 4294967040 }
 0x8f0   :  { %959 = vsyncpa [#allocation3], 1 }
 0x8f1   :  { %960 = vsyncpa [#allocation6], 1 }
 0x8f2   :  { %961 = vsyncpa [#allocation4], 1 }

</bundles_post_ra>
